<compile_context>
chip_gen: v6e
topology: v6e:2x2x1
jax: 0.10.0
libtpu: 0.0.40
codegen_flags: <defaults>
</compile_context>

<pallas_src>
import math
import functools

import jax
import jax.numpy as jnp
from jax import lax
from jax.experimental import pallas as pl
from jax.experimental.pallas import tpu as pltpu


def _decoder_kernel(enc_ref, x_ref, wqk_ref, wv_ref, bv_ref, out_ref,
                    m_scr, c_scr, *, mm_dtype):
    """Block shapes (leading batch dim squeezed via BlockSpec `None`):
         enc_ref : (pd, Ne)          channel-first encoded points (full Ne)
         x_ref   : (pd, block_nx)    channel-first decoded points (one Nx tile)
         wqk_ref : (H, L, pd)        shared q/k Conv1d weights (VMEM resident)
         wv_ref  : (H, L, pd)        v Conv1d weights
         bv_ref  : (H, L, 1)         v Conv1d bias
         out_ref : (H*L, block_nx)   heads concatenated along channels
         m_scr   : (H*L, pd)  f32    (A @ Wv) stacked over heads  -- persists
         c_scr   : (H*L, 1)   f32    (A @ bv) stacked over heads     across Nx tiles
    """
    H, L, pd = wqk_ref.shape

    # ---- per-batch prep: first Nx tile only, reused across remaining tiles ----
    @pl.when(pl.program_id(1) == 0)
    def _prep():
        enc = enc_ref[...].astype(mm_dtype)                        # (pd, Ne)
        # Gram matrix over encoded points: contracts the (large) Ne axis once
        # for ALL heads instead of per-head Q @ Q^T.  No transposes: contract
        # the minor axis of both operands directly.
        g = lax.dot_general(enc, enc, (((1,), (1,)), ((), ())),
                            preferred_element_type=jnp.float32)    # (pd, pd)
        scale = 1.0 / math.sqrt(float(L))

        for h in range(H):                    # static unroll, H is tiny
            w = wqk_ref[h]                                          # (L, pd)
            t = jnp.dot(w, g, preferred_element_type=jnp.float32)   # (L, pd)
            s = lax.dot_general(t, w, (((1,), (1,)), ((), ())),
                                preferred_element_type=jnp.float32)  # (L, L)
            s = s * scale
            # numerically stable softmax; the 1/sum normalization is folded
            # into the tiny (L, pd)/(L, 1) results instead of the (L, L) matrix.
            s_max = jnp.max(s, axis=-1, keepdims=True)
            p = jnp.exp(s - s_max)                                  # (L, L)
            inv = 1.0 / jnp.sum(p, axis=-1, keepdims=True)          # (L, 1)
            m = jnp.dot(p, wv_ref[h],
                        preferred_element_type=jnp.float32) * inv   # (L, pd)
            c = jnp.dot(p, bv_ref[h],
                        preferred_element_type=jnp.float32) * inv   # (L, 1)
            m_scr[pl.ds(h * L, L), :] = m
            c_scr[pl.ds(h * L, L), :] = c

    # ---- per-Nx-tile work: one (H*L, pd) @ (pd, block_nx) matmul + bias ----
    out = jnp.dot(m_scr[...].astype(mm_dtype), x_ref[...].astype(mm_dtype),
                  preferred_element_type=jnp.float32)               # (HL, blk)
    out_ref[...] = (out + c_scr[...]).astype(out_ref.dtype)


def _pick_nx_block(nx, hl, pd):
    """Largest 128-multiple tile dividing Nx whose double-buffered x/out blocks
    stay small even for v7x's 32 MiB scoped / 64 MiB physical VMEM."""
    budget = 8 << 20                     # bytes, conservative across v5e/v6e/v7x
    for blk in (4096, 2048, 1024, 512, 256, 128):
        if nx % blk == 0 and 2 * (hl + pd) * blk * 4 <= budget:
            return blk
    # TODO(synk): pad Nx to a multiple of 128 for lane-dense stores when Nx is
    # small / has no 128-multiple divisor; falling back to one full block.
    return nx


def point_diffusion_decoder(encoded_x, x, wqk, wv, bv, *,
                            block_nx=None, matmul_dtype=jnp.float32):
    """encoded_x : (B, point_dim, Ne) f32  (the module's `encoded_x`)
       x         : (B, Nx, point_dim) f32  (the module's `x`)
       wqk, wv   : (H, L, point_dim)       stacked Conv1d(point_dim, L, 1) weights
       bv        : (H, L, 1)               v_conv bias
       returns   : (B, H*L, Nx) f32  ==  torch.cat(headers, dim=1)

    matmul_dtype=jnp.bfloat16 switches the two large matmuls to bf16 MXU
    operands (f32 accumulation).  Default stays f32: after the algebraic
    rewrite the kernel is bandwidth-bound (read x, write out), so bf16 buys
    little and f32 preserves reference-level numerics.
    """
    # TODO(synk): heterogeneous head_dims would need per-head weight arrays;
    # stacked weights here assume all head dims are equal.
    B, pd, Ne = encoded_x.shape
    _, Nx, pd_x = x.shape
    H, L, pd_w = wqk.shape
    assert pd == pd_x == pd_w, (pd, pd_x, pd_w)
    HL = H * L

    # Present x channel-first to the kernel (wrapper-side layout plumbing) so
    # no in-kernel transpose / XLU work is needed.
    x_cf = jnp.swapaxes(x, 1, 2)                        # (B, pd, Nx)

    if block_nx is None:
        block_nx = _pick_nx_block(Nx, HL, pd)
    assert Nx % block_nx == 0, (Nx, block_nx)
    n_nx = Nx // block_nx

    kernel = functools.partial(_decoder_kernel, mm_dtype=matmul_dtype)

    out = pl.pallas_call(
        kernel,
        out_shape=jax.ShapeDtypeStruct((B, HL, Nx), jnp.float32),
        grid_spec=pltpu.PrefetchScalarGridSpec(
            num_scalar_prefetch=0,
            grid=(B, n_nx),                             # (batch, Nx tiles)
            in_specs=[
                # per-batch encoded points; re-fetched only when b changes
                pl.BlockSpec((None, pd, Ne), lambda b, n: (b, 0, 0)),
                # per-(batch, Nx-tile) decoded points
                pl.BlockSpec((None, pd, block_nx), lambda b, n: (b, 0, n)),
                # tiny weights: full blocks + constant index_map => VMEM
                # resident, never re-DMAed across grid steps
                pl.BlockSpec((H, L, pd), lambda b, n: (0, 0, 0)),
                pl.BlockSpec((H, L, pd), lambda b, n: (0, 0, 0)),
                pl.BlockSpec((H, L, 1), lambda b, n: (0, 0, 0)),
            ],
            out_specs=pl.BlockSpec((None, HL, block_nx), lambda b, n: (b, 0, n)),
            scratch_shapes=[
                pltpu.VMEM((HL, pd), jnp.float32),      # (A @ Wv) stacked heads
                pltpu.VMEM((HL, 1), jnp.float32),       # (A @ bv) stacked heads
            ],
        ),
        # batch axis is parallel (v7x megacore sharding); the Nx-tile axis is
        # "arbitrary" because the per-batch scratch computed at tile 0 is reused.
        compiler_params=pltpu.CompilerParams(
            dimension_semantics=("parallel", "arbitrary")),
    )(encoded_x, x_cf, wqk, wv, bv)
    return out


def reference_decoder(encoded_x, x, wqk, wv, bv):
    """Pure-JAX reference mirroring the PyTorch forward exactly."""
    H, L, _ = wqk.shape
    outs = []
    for h in range(H):
        q = jnp.einsum('lp,bpn->bln', wqk[h], encoded_x)              # (B,L,Ne)
        s = jnp.einsum('bln,bmn->blm', q, q) / math.sqrt(float(L))    # (B,L,L)
        a = jax.nn.softmax(s, axis=-1)
        v = jnp.einsum('lp,bnp->bln', wv[h], x) + bv[h][None]         # (B,L,Nx)
        outs.append(jnp.einsum('blm,bmn->bln', a, v))
    return jnp.concatenate(outs, axis=1)


if __name__ == "__main__":
    B = 2
    point_dim = 4
    Ne = 64                 # encoded points
    Nx = 256                # decoded points
    head_dims = (16, 16)    # equal head dims (see TODO above)
    H, L = len(head_dims), head_dims[0]

    key = jax.random.PRNGKey(0)
    k_enc, k_x, k_wqk, k_wv, k_bv = jax.random.split(key, 5)

    encoded_x = jax.random.normal(k_enc, (B, point_dim, Ne), dtype=jnp.float32)
    x = jax.random.normal(k_x, (B, Nx, point_dim), dtype=jnp.float32)

    # Conv1d(point_dim, L, 1) weights: (L, point_dim) per head (k=1 squeezed).
    wqk = jax.random.normal(k_wqk, (H, L, point_dim), dtype=jnp.float32) * 0.2
    wv = jax.random.normal(k_wv, (H, L, point_dim), dtype=jnp.float32) * 0.2
    bv = jax.random.normal(k_bv, (H, L, 1), dtype=jnp.float32) * 0.1

    # Tiled path (2 Nx tiles -> exercises the pl.when scratch reuse).
    fn_tiled = jax.jit(functools.partial(point_diffusion_decoder, block_nx=128))
    out_tiled = fn_tiled(encoded_x, x, wqk, wv, bv)
    jax.block_until_ready(out_tiled)

    # Default block-size selection path.
    fn_default = jax.jit(point_diffusion_decoder)
    out_default = fn_default(encoded_x, x, wqk, wv, bv)
    jax.block_until_ready(out_default)

    ref = reference_decoder(encoded_x, x, wqk, wv, bv)
    assert out_tiled.shape == (B, sum(head_dims), Nx), out_tiled.shape
    assert jnp.allclose(out_tiled, ref, rtol=1e-4, atol=5e-5), float(
        jnp.max(jnp.abs(out_tiled - ref)))
    assert jnp.allclose(out_default, ref, rtol=1e-4, atol=5e-5), float(
        jnp.max(jnp.abs(out_default - ref)))

    print("KERNEL_OK")
</pallas_src>

<mosaic_0001>
module attributes {stable_mosaic.version = 11 : i64} {
  func.func @_decoder_kernel(%arg0: i32, %arg1: i32, %arg2: memref<1x4x64xf32, #tpu.memory_space<vmem>>, %arg3: memref<1x4x128xf32, #tpu.memory_space<vmem>>, %arg4: memref<2x16x4xf32, #tpu.memory_space<vmem>>, %arg5: memref<2x16x4xf32, #tpu.memory_space<vmem>>, %arg6: memref<2x16x1xf32, #tpu.memory_space<vmem>>, %arg7: memref<1x32x128xf32, #tpu.memory_space<vmem>>, %arg8: memref<32x4xf32, #tpu.memory_space<vmem>>, %arg9: memref<32x1xf32, #tpu.memory_space<vmem>>) attributes {dimension_semantics = [#tpu.dimension_semantics<parallel>, #tpu.dimension_semantics<arbitrary>], iteration_bounds = array<i64: 2, 2>, scalar_prefetch = 0 : i64, scratch_operands = 2 : i64, tpu.core_type = #tpu.core_type<tc>, window_params = [{transform_indices = @transform_0, window_bounds = array<i64: 1, 4, 64>}, {transform_indices = @transform_1, window_bounds = array<i64: 1, 4, 128>}, {pipeline_mode = #tpu.pipeline_mode<synchronous>, transform_indices = @transform_2, window_bounds = array<i64: 2, 16, 4>}, {pipeline_mode = #tpu.pipeline_mode<synchronous>, transform_indices = @transform_3, window_bounds = array<i64: 2, 16, 4>}, {pipeline_mode = #tpu.pipeline_mode<synchronous>, transform_indices = @transform_4, window_bounds = array<i64: 2, 16, 1>}, {transform_indices = @transform_5, window_bounds = array<i64: 1, 32, 128>}]} {
    %c0_i32 = arith.constant 0 : i32
    %0 = arith.cmpi eq, %arg1, %c0_i32 : i32
    %1 = arith.extui %0 : i1 to i32
    %c0_i32_0 = arith.constant 0 : i32
    %2 = arith.cmpi ne, %1, %c0_i32_0 : i32
    scf.if %2 {
      %c0_10 = arith.constant 0 : index
      %c0_11 = arith.constant 0 : index
      %c0_12 = arith.constant 0 : index
      %13 = vector.load %arg2[%c0_10, %c0_11, %c0_12] : memref<1x4x64xf32, #tpu.memory_space<vmem>>, vector<1x4x64xf32>
      %14 = vector.shape_cast %13 : vector<1x4x64xf32> to vector<4x64xf32>
      %cst_13 = arith.constant dense<0.000000e+00> : vector<4x4xf32>
      %15 = tpu.matmul %14, %14, %cst_13 {dimension_numbers = #tpu.dot_dimension_numbers<[1], [1], [0], [0], [0, 0, 1, 0], [], []>} : vector<4x64xf32>, vector<4x64xf32>, vector<4x4xf32> -> vector<4x4xf32>
      %c0_14 = arith.constant 0 : index
      %c0_15 = arith.constant 0 : index
      %c0_16 = arith.constant 0 : index
      %16 = vector.load %arg4[%c0_14, %c0_15, %c0_16] : memref<2x16x4xf32, #tpu.memory_space<vmem>>, vector<1x16x4xf32>
      %17 = vector.shape_cast %16 : vector<1x16x4xf32> to vector<16x4xf32>
      %cst_17 = arith.constant dense<0.000000e+00> : vector<16x4xf32>
      %18 = tpu.matmul %17, %15, %cst_17 {dimension_numbers = #tpu.dot_dimension_numbers<[1], [0], [0], [1], [0, 0, 1, 1], [], []>} : vector<16x4xf32>, vector<4x4xf32>, vector<16x4xf32> -> vector<16x4xf32>
      %cst_18 = arith.constant dense<0.000000e+00> : vector<16x16xf32>
      %19 = tpu.matmul %18, %17, %cst_18 {dimension_numbers = #tpu.dot_dimension_numbers<[1], [1], [0], [0], [0, 0, 1, 0], [], []>} : vector<16x4xf32>, vector<16x4xf32>, vector<16x16xf32> -> vector<16x16xf32>
      %cst_19 = arith.constant 2.500000e-01 : f32
      %20 = vector.broadcast %cst_19 : f32 to vector<16x16xf32>
      %21 = arith.mulf %19, %20 : vector<16x16xf32>
      %cst_20 = arith.constant dense<0xFF800000> : vector<16xf32>
      %22 = vector.multi_reduction <maximumf>, %21, %cst_20 [1] : vector<16x16xf32> to vector<16xf32>
      %23 = vector.shape_cast %22 : vector<16xf32> to vector<16x1xf32>
      %24 = vector.broadcast %23 : vector<16x1xf32> to vector<16x16xf32>
      %25 = arith.subf %21, %24 : vector<16x16xf32>
      %26 = math.exp %25 : vector<16x16xf32>
      %cst_21 = arith.constant dense<0.000000e+00> : vector<16xf32>
      %27 = vector.multi_reduction <add>, %26, %cst_21 [1] : vector<16x16xf32> to vector<16xf32>
      %28 = vector.shape_cast %27 : vector<16xf32> to vector<16x1xf32>
      %cst_22 = arith.constant 1.000000e+00 : f32
      %29 = vector.broadcast %cst_22 : f32 to vector<16x1xf32>
      %30 = arith.divf %29, %28 : vector<16x1xf32>
      %c0_23 = arith.constant 0 : index
      %c0_24 = arith.constant 0 : index
      %c0_25 = arith.constant 0 : index
      %31 = vector.load %arg5[%c0_23, %c0_24, %c0_25] : memref<2x16x4xf32, #tpu.memory_space<vmem>>, vector<1x16x4xf32>
      %32 = vector.shape_cast %31 : vector<1x16x4xf32> to vector<16x4xf32>
      %cst_26 = arith.constant dense<0.000000e+00> : vector<16x4xf32>
      %33 = tpu.matmul %26, %32, %cst_26 {dimension_numbers = #tpu.dot_dimension_numbers<[1], [0], [0], [1], [0, 0, 1, 1], [], []>} : vector<16x16xf32>, vector<16x4xf32>, vector<16x4xf32> -> vector<16x4xf32>
      %34 = vector.broadcast %30 : vector<16x1xf32> to vector<16x4xf32>
      %35 = arith.mulf %33, %34 : vector<16x4xf32>
      %c0_27 = arith.constant 0 : index
      %c0_28 = arith.constant 0 : index
      %c0_29 = arith.constant 0 : index
      %36 = vector.load %arg6[%c0_27, %c0_28, %c0_29] : memref<2x16x1xf32, #tpu.memory_space<vmem>>, vector<1x16x1xf32>
      %37 = vector.shape_cast %36 : vector<1x16x1xf32> to vector<16x1xf32>
      %cst_30 = arith.constant dense<0.000000e+00> : vector<16x1xf32>
      %38 = tpu.matmul %26, %37, %cst_30 {dimension_numbers = #tpu.dot_dimension_numbers<[1], [0], [0], [1], [0, 0, 1, 1], [], []>} : vector<16x16xf32>, vector<16x1xf32>, vector<16x1xf32> -> vector<16x1xf32>
      %39 = arith.mulf %38, %30 : vector<16x1xf32>
      %c0_31 = arith.constant 0 : index
      %c0_32 = arith.constant 0 : index
      %40 = vector.load %arg8[%c0_31, %c0_32] : memref<32x4xf32, #tpu.memory_space<vmem>>, vector<16x4xf32>
      tpu.vector_store %arg8[%c0_31, %c0_32], %35 {strides = array<i32>} : memref<32x4xf32, #tpu.memory_space<vmem>>, vector<16x4xf32>,
      %c0_33 = arith.constant 0 : index
      %c0_34 = arith.constant 0 : index
      %41 = vector.load %arg9[%c0_33, %c0_34] : memref<32x1xf32, #tpu.memory_space<vmem>>, vector<16x1xf32>
      tpu.vector_store %arg9[%c0_33, %c0_34], %39 {strides = array<i32>} : memref<32x1xf32, #tpu.memory_space<vmem>>, vector<16x1xf32>,
      %c1 = arith.constant 1 : index
      %c0_35 = arith.constant 0 : index
      %c0_36 = arith.constant 0 : index
      %42 = vector.load %arg4[%c1, %c0_35, %c0_36] : memref<2x16x4xf32, #tpu.memory_space<vmem>>, vector<1x16x4xf32>
      %43 = vector.shape_cast %42 : vector<1x16x4xf32> to vector<16x4xf32>
      %cst_37 = arith.constant dense<0.000000e+00> : vector<16x4xf32>
      %44 = tpu.matmul %43, %15, %cst_37 {dimension_numbers = #tpu.dot_dimension_numbers<[1], [0], [0], [1], [0, 0, 1, 1], [], []>} : vector<16x4xf32>, vector<4x4xf32>, vector<16x4xf32> -> vector<16x4xf32>
      %cst_38 = arith.constant dense<0.000000e+00> : vector<16x16xf32>
      %45 = tpu.matmul %44, %43, %cst_38 {dimension_numbers = #tpu.dot_dimension_numbers<[1], [1], [0], [0], [0, 0, 1, 0], [], []>} : vector<16x4xf32>, vector<16x4xf32>, vector<16x16xf32> -> vector<16x16xf32>
      %cst_39 = arith.constant 2.500000e-01 : f32
      %46 = vector.broadcast %cst_39 : f32 to vector<16x16xf32>
      %47 = arith.mulf %45, %46 : vector<16x16xf32>
      %cst_40 = arith.constant dense<0xFF800000> : vector<16xf32>
      %48 = vector.multi_reduction <maximumf>, %47, %cst_40 [1] : vector<16x16xf32> to vector<16xf32>
      %49 = vector.shape_cast %48 : vector<16xf32> to vector<16x1xf32>
      %50 = vector.broadcast %49 : vector<16x1xf32> to vector<16x16xf32>
      %51 = arith.subf %47, %50 : vector<16x16xf32>
      %52 = math.exp %51 : vector<16x16xf32>
      %cst_41 = arith.constant dense<0.000000e+00> : vector<16xf32>
      %53 = vector.multi_reduction <add>, %52, %cst_41 [1] : vector<16x16xf32> to vector<16xf32>
      %54 = vector.shape_cast %53 : vector<16xf32> to vector<16x1xf32>
      %cst_42 = arith.constant 1.000000e+00 : f32
      %55 = vector.broadcast %cst_42 : f32 to vector<16x1xf32>
      %56 = arith.divf %55, %54 : vector<16x1xf32>
      %c1_43 = arith.constant 1 : index
      %c0_44 = arith.constant 0 : index
      %c0_45 = arith.constant 0 : index
      %57 = vector.load %arg5[%c1_43, %c0_44, %c0_45] : memref<2x16x4xf32, #tpu.memory_space<vmem>>, vector<1x16x4xf32>
      %58 = vector.shape_cast %57 : vector<1x16x4xf32> to vector<16x4xf32>
      %cst_46 = arith.constant dense<0.000000e+00> : vector<16x4xf32>
      %59 = tpu.matmul %52, %58, %cst_46 {dimension_numbers = #tpu.dot_dimension_numbers<[1], [0], [0], [1], [0, 0, 1, 1], [], []>} : vector<16x16xf32>, vector<16x4xf32>, vector<16x4xf32> -> vector<16x4xf32>
      %60 = vector.broadcast %56 : vector<16x1xf32> to vector<16x4xf32>
      %61 = arith.mulf %59, %60 : vector<16x4xf32>
      %c1_47 = arith.constant 1 : index
      %c0_48 = arith.constant 0 : index
      %c0_49 = arith.constant 0 : index
      %62 = vector.load %arg6[%c1_47, %c0_48, %c0_49] : memref<2x16x1xf32, #tpu.memory_space<vmem>>, vector<1x16x1xf32>
      %63 = vector.shape_cast %62 : vector<1x16x1xf32> to vector<16x1xf32>
      %cst_50 = arith.constant dense<0.000000e+00> : vector<16x1xf32>
      %64 = tpu.matmul %52, %63, %cst_50 {dimension_numbers = #tpu.dot_dimension_numbers<[1], [0], [0], [1], [0, 0, 1, 1], [], []>} : vector<16x16xf32>, vector<16x1xf32>, vector<16x1xf32> -> vector<16x1xf32>
      %65 = arith.mulf %64, %56 : vector<16x1xf32>
      %c16 = arith.constant 16 : index
      %c0_51 = arith.constant 0 : index
      %66 = vector.load %arg8[%c16, %c0_51] : memref<32x4xf32, #tpu.memory_space<vmem>>, vector<16x4xf32>
      tpu.vector_store %arg8[%c16, %c0_51], %61 {strides = array<i32>} : memref<32x4xf32, #tpu.memory_space<vmem>>, vector<16x4xf32>,
      %c16_52 = arith.constant 16 : index
      %c0_53 = arith.constant 0 : index
      %67 = vector.load %arg9[%c16_52, %c0_53] : memref<32x1xf32, #tpu.memory_space<vmem>>, vector<16x1xf32>
      tpu.vector_store %arg9[%c16_52, %c0_53], %65 {strides = array<i32>} : memref<32x1xf32, #tpu.memory_space<vmem>>, vector<16x1xf32>,
    } else {
    }
    %c0 = arith.constant 0 : index
    %c0_1 = arith.constant 0 : index
    %3 = vector.load %arg8[%c0, %c0_1] : memref<32x4xf32, #tpu.memory_space<vmem>>, vector<32x4xf32>
    %c0_2 = arith.constant 0 : index
    %c0_3 = arith.constant 0 : index
    %c0_4 = arith.constant 0 : index
    %4 = vector.load %arg3[%c0_2, %c0_3, %c0_4] : memref<1x4x128xf32, #tpu.memory_space<vmem>>, vector<1x4x128xf32>
    %5 = vector.shape_cast %4 : vector<1x4x128xf32> to vector<4x128xf32>
    %cst = arith.constant dense<0.000000e+00> : vector<32x128xf32>
    %6 = tpu.matmul %3, %5, %cst {dimension_numbers = #tpu.dot_dimension_numbers<[1], [0], [0], [1], [0, 0, 1, 1], [], []>} : vector<32x4xf32>, vector<4x128xf32>, vector<32x128xf32> -> vector<32x128xf32>
    %c0_5 = arith.constant 0 : index
    %c0_6 = arith.constant 0 : index
    %7 = vector.load %arg9[%c0_5, %c0_6] : memref<32x1xf32, #tpu.memory_space<vmem>>, vector<32x1xf32>
    %8 = vector.broadcast %7 : vector<32x1xf32> to vector<32x128xf32>
    %9 = arith.addf %6, %8 : vector<32x128xf32>
    %c0_7 = arith.constant 0 : index
    %c0_8 = arith.constant 0 : index
    %c0_9 = arith.constant 0 : index
    %10 = vector.load %arg7[%c0_7, %c0_8, %c0_9] : memref<1x32x128xf32, #tpu.memory_space<vmem>>, vector<1x32x128xf32>
    %11 = vector.shape_cast %10 : vector<1x32x128xf32> to vector<32x128xf32>
    %12 = vector.shape_cast %9 : vector<32x128xf32> to vector<1x32x128xf32>
    tpu.vector_store %arg7[%c0_7, %c0_8, %c0_9], %12 {strides = array<i32>} : memref<1x32x128xf32, #tpu.memory_space<vmem>>, vector<1x32x128xf32>,
    return
  }
  func.func @transform_0(%arg0: i32, %arg1: i32) -> (i32, i32, i32) {
    %c0_i32 = arith.constant 0 : i32
    %c0_i32_0 = arith.constant 0 : i32
    %c0_i32_1 = arith.constant 0 : i32
    return %arg0, %c0_i32, %c0_i32_0 : i32, i32, i32
  }
  func.func @transform_1(%arg0: i32, %arg1: i32) -> (i32, i32, i32) {
    %c0_i32 = arith.constant 0 : i32
    %c0_i32_0 = arith.constant 0 : i32
    return %arg0, %c0_i32, %arg1 : i32, i32, i32
  }
  func.func @transform_2(%arg0: i32, %arg1: i32) -> (i32, i32, i32) {
    %c0_i32 = arith.constant 0 : i32
    %c0_i32_0 = arith.constant 0 : i32
    %c0_i32_1 = arith.constant 0 : i32
    %c0_i32_2 = arith.constant 0 : i32
    return %c0_i32, %c0_i32_0, %c0_i32_1 : i32, i32, i32
  }
  func.func @transform_3(%arg0: i32, %arg1: i32) -> (i32, i32, i32) {
    %c0_i32 = arith.constant 0 : i32
    %c0_i32_0 = arith.constant 0 : i32
    %c0_i32_1 = arith.constant 0 : i32
    %c0_i32_2 = arith.constant 0 : i32
    return %c0_i32, %c0_i32_0, %c0_i32_1 : i32, i32, i32
  }
  func.func @transform_4(%arg0: i32, %arg1: i32) -> (i32, i32, i32) {
    %c0_i32 = arith.constant 0 : i32
    %c0_i32_0 = arith.constant 0 : i32
    %c0_i32_1 = arith.constant 0 : i32
    %c0_i32_2 = arith.constant 0 : i32
    return %c0_i32, %c0_i32_0, %c0_i32_1 : i32, i32, i32
  }
  func.func @transform_5(%arg0: i32, %arg1: i32) -> (i32, i32, i32) {
    %c0_i32 = arith.constant 0 : i32
    %c0_i32_0 = arith.constant 0 : i32
    return %arg0, %c0_i32, %arg1 : i32, i32, i32
  }
}

</mosaic_0001>

<bundles_post_ra>
// kernel: point_diffusion_decoder.1
= control target key start
LH: loop header
LB: loop body
LE: loop exit
PB: predicated region body
PF: predicated region fallthrough
CT: control target
= control target key end

     0   :  { %10 = vsyncpa [#allocation5], 0  ;;  %s1926_s0 = inlined_call_operand.vmem [shape: f32[2,4,64], index: 0, kind: input, shape index: {}]   ;;  %s1927_s1 = inlined_call_operand.vmem [shape: f32[2,4,256], index: 1, kind: input, shape index: {}]   ;;  %s1928_s2 = inlined_call_operand.vmem [shape: f32[2,16,4], index: 2, kind: input, shape index: {}]   ;;  %s1929_s3 = inlined_call_operand.vmem [shape: f32[2,16,4], index: 3, kind: input, shape index: {}]   ;;  %s1930_s4 = inlined_call_operand.vmem [shape: f32[2,16,1], index: 4, kind: input, shape index: {}]   ;;  %s1931_s5 = inlined_call_operand.hbm [shape: f32[2,32,256], index: 5, kind: output, shape index: {}]  }
   0x1   :  { %12 = vsyncpa [#allocation5 + $0x1], 0  ;;  %s1689_s18 = smov 0   ;;  %s1691_s19 = smov 0  }
   0x2   :  { %s1693_s20 = smov 0   ;;  %s1695_s21 = smov 0  }
   0x3   :  { %s1697_s22 = smov 0   ;;  %s1699_s23 = smov 0  }
   0x4   :  { %s1701_s24 = smov 0   ;;  %s1703_s25 = smov 0  }
   0x5 LB: > { %1935 = sst [smem:[#allocation7_spill]] %s1646_s24  ;;  %s1309_s26 = sadd.s32 4294967295, %s1650_s25   ;;  %s1650_s25 = sphi %s1703_s25, %s18_s25   ;;  %s1646_s24 = sphi %s1701_s24, %s1942_s24   ;;  %s1642_s23 = sphi %s1699_s23, %s1947_s23   ;;  %s1638_s22 = sphi %s1697_s22, %s1940_s22   ;;  %s1634_s21 = sphi %s1695_s21, %s1946_s21   ;;  %s1630_s20 = sphi %s1693_s20, %s1945_s20   ;;  %s1626_s19 = sphi %s1691_s19, %s1944_s19   ;;  %s1622_s18 = sphi %s1689_s18, %s1943_s18  }
   0x6   : > { %s1310_s27 = sadd.s32 4294967294, %s1650_s25   ;;  %s27_s28 = sadd.s32 1, %s1642_s23 }
   0x7   : > { %p28_p0 = scmp.ge.s32.totalorder %s27_s28, 2  ;;  %s30_s29 = sadd.s32 1, %s1646_s24 }
   0x8   : > { %p166_p1 = scmp.ne.s32.totalorder %s1630_s20, %s1626_s19  ;;  %p167_p2 = scmp.eq.s32.totalorder %s1309_s26, 3 }
   0x9   : > { %s1949_s28 = smov (%p28_p0, %s27_s28), 0  ;;  %s1951_s29 = smov (!%p28_p0, %s30_s29), %s1646_s24 }
   0xa   : > { %1936 = sst [smem:[#allocation8_spill]] %s1949_s28  ;;  %s152_s30 = ssub.s32 %s1642_s23, %s1949_s28 }
   0xb   : > { %p1740_p3 = por %p167_p2, %p166_p1  ;;  %p32_p4 = scmp.ge.s32.totalorder %s1951_s29, 2 }
   0xc   : > { %p172_p5 = scmp.ne.s32.totalorder %s1626_s19, %s1622_s18  ;;  %p173_p6 = scmp.eq.s32.totalorder %s1310_s27, 3 }
   0xd   : > { %p1313_p7 = scmp.ge.s32.totalorder %s1650_s25, 1  ;;  %s1953_s29 = smov (%p32_p4, %s1951_s29), 0 }
   0xe   : > { %1938 = sst [smem:[#allocation9_spill]] %s1953_s29  ;;  %p1749_p8 = por %p173_p6, %p172_p5 }
   0xf   : > { %p218_p9 = scmp.lt.s32.totalorder %s1650_s25, 5  ;;  %s151_s8 = ssub.s32 %s1646_s24, %s1953_s29 }
  0x10   : > { %s156_s9 = sadd.s32 1, %s1630_s20  ;;  %s153_s10 = sor.u32 %s152_s30, %s151_s8 }
  0x11   : > { %p219_p10 = pnand %p1313_p7, %p218_p9  ;;  %p154_p11 = scmp.eq.s32.totalorder %s153_s10, 0 }
  0x12   : > { %s250_s12 = sand.u32 (!%p219_p10), 1, %s1626_s19   ;;  %p253_p12 = scmp.lt.s32.totalorder (!%p219_p10), %s1638_s22, 1 }
  0x13   : > { %s1758_s11 = scalar_select %p154_p11, %s1630_s20, %s156_s9  }
  0x14   : > { %222 = sbr.rel (%p219_p10) target bundleno = 1576 (0x628), region = 40  ;;  %s1314_s13 = sshll.u32 (!%p219_p10), %s250_s12, 5 }
  0x15   : > { %p259_p13 = scmp.lt.s32.totalorder (!%p219_p10), %s1634_s21, 1  ;;  %s1775_s24 = scalar_lea.vmem (!%p219_p10), [#allocation4], %s1314_s13 }
  0x16   : > { %p1318_p0 = scmp.ne.s32.totalorder (!%p219_p10), %s1634_s21, 0 }
  0x19   : > { %s254_s14 = scalar_select %p253_p12, %s1638_s22, 1 }
  0x1a   : > { %s260_s15 = scalar_select %p259_p13, %s1634_s21, 1 }
  0x1b   : > { %s1315_s16 = sshll.u32 %s254_s14, 2  ;;  %s1316_s17 = sshll.u32 %s254_s14, 1 }
  0x1c   : > { %s256_s30 = scalar_lea.vmem %s1926_s0, %s1315_s16  ;;  %s262_s8 = sadd.s32 %s1316_s17, %s260_s15 }
  0x1d   : > { %s1317_s9 = sshll.u32 %s262_s8, 2  ;;  %268 = sbr.rel (%p1318_p0) target bundleno = 1360 (0x550), region = 44 }
  0x1e   : > { %s1773_s28 = scalar_lea.vmem %s1927_s1, %s1317_s9 }
  0x22   : > { %v269_v0 = vld [vmem:[%s256_s30] sm:$0xf]  ;;  %vm270_vm0 = vcmask 523264   ;;  %v1652_v1 = vmov 0.0   ;;  %vm1653_vm1 = vmmov 0   ;;  %vm346_vm2 = vcmask 31744  }
  0x23   : > { %1396 = vmatprep.subr.mxu0 %v1652_v1  ;;  %1398 = vmatprep.mubr.msk.f32.mxu0 %vm1653_vm1, %v1652_v1  ;;  %v344_v2 = vld [vmem:[%s1928_s2] sm:$0xff]  ;;  %vm353_vm3 = vcmask 1043456   ;;  %v345_v4 = vld [vmem:[%s1928_s2 + $0x8] sm:$0xff]  ;;  %v1332_v8 = vld [vmem:[%s1928_s2 + $0x10] sm:$0xff]  ;;  %vm515_vm4 = vcmask 130048   ;;  %vm704_vm5 = vcmask 7168  }
  0x24   : > { %1397 = vmatpush3.xpose.msk.msra.mxu0 %vm270_vm0, %v269_v0  ;;  %1403 = vmatprep.mubr.msk.f32.mxu1 %vm346_vm2, %v344_v2  ;;  %v1333_v9 = vld [vmem:[%s1928_s2 + $0x18] sm:$0xff]  ;;  %v539_v16 = vld [vmem:[%s1929_s3 + $0x8] sm:$0xff]  ;;  %v538_v17 = vld [vmem:[%s1929_s3] sm:$0xff] }
  0x25   : > { %1413 = vmatprep.subr.mxu0 %v539_v16  ;;  %v624_v18 = vld [vmem:[%s1930_s4 + $0x8] sm:$0xff]  ;;  %v623_v29 = vld [vmem:[%s1930_s4] sm:$0xff]  ;;  %v1342_v46 = vld [vmem:[%s1929_s3 + $0x18] sm:$0xff] }
  0x26   : > { %v1341_v47 = vld [vmem:[%s1929_s3 + $0x10] sm:$0xff]  ;;  %v1346_v48 = vld [vmem:[%s1930_s4 + $0x18] sm:$0xff] }
  0x27   : > { %1399 = vmatmul.mubr.msk.f32.vlgmr.msra.gmra.mxu0 %vm270_vm0, %v269_v0  ;;  %v1345_v59 = vld [vmem:[%s1930_s4 + $0x10] sm:$0xff] }
  0x28   : > { %1414 = vmatpush3.msra.mxu0 %v539_v16 }
  0x29   : > { %1415 = vmatprep.subr.mxu0 %v538_v17 }
  0x2a   : > { %1416 = vmatpush3.msra.mxu0 %v538_v17 }
  0x2b   : > { %1420 = vmatprep.subr.mxu0 %v624_v18 }
  0xe7   : > { %v340_v3 = vpop.f32.mrf.mxu0 }
  0xe8   : > { %1401 = vmatprep.subr.msk.mxu1 %vm353_vm3, %v340_v3 }
  0xe9   : > { %v1400_v5 = vpop.f32.mrf.mxu0  ;;  %1402 = vmatpush3.msk.msra.mxu1 %vm353_vm3, %v340_v3 }
  0xea   : > { %1404 = vmatmul.mubr.msk.f32.vlgmr.msra.gmra.mxu1 %vm346_vm2, %v345_v4  ;;  %1406 = vmatprep.subr.msk.mxu1 %vm346_vm2, %v345_v4 }
  0xeb   : > { %1407 = vmatpush3.xpose.msk.msra.mxu1 %vm346_vm2, %v345_v4 }
  0xec   : > { %1408 = vmatprep.subr.msk.mxu1 %vm346_vm2, %v344_v2 }
  0xef   : > { %1409 = vmatpush3.xpose.msk.msra.mxu1 %vm346_vm2, %v344_v2 }
  0xf0   : > { %1427 = vmatprep.subr.msk.mxu1 %vm353_vm3, %v340_v3 }
 0x1aa   : > { %v1405_v6 = vpop.f32.mrf.mxu1 }
 0x1ac   : > { %v423_v7 = vpop.f32.mrf.mxu1 }
 0x1ad   : > { %1410 = vmatprep.mubr.msk.f32.mxu1 %vm346_vm2, %v423_v7 }
 0x1ae   : > { %1411 = vmatmul.mubr.msk.f32.vlgmr.msra.gmra.mxu1 %vm346_vm2, %v1405_v6 }
 0x1af   : > { %1428 = vmatpush3.msk.msra.mxu1 %vm353_vm3, %v340_v3  ;;  %1429 = vmatprep.mubr.msk.f32.mxu1 %vm346_vm2, %v1332_v8 }
 0x1b0   : > { %1439 = vmatprep.subr.mxu1 %v1342_v46 }
 0x1b2   : > { %1430 = vmatmul.mubr.msk.f32.vlgmr.msra.gmra.mxu1 %vm346_vm2, %v1333_v9 }
 0x1b3   : > { %1440 = vmatpush3.msra.mxu1 %v1342_v46 }
 0x1b4   : > { %1441 = vmatprep.subr.mxu1 %v1341_v47 }
 0x1b5   : > { %1442 = vmatpush3.msra.mxu1 %v1341_v47 }
 0x1b6   : > { %1446 = vmatprep.subr.mxu1 %v1346_v48 }
 0x26e   : > { %v1412_v10 = vpop.f32.mrf.mxu1 }
 0x26f   : > { %v514_v13 = vmul.f32 0.25, %v1412_v10 }
 0x270   : > { %v504_v11 = vpop.f32.mrf.mxu1 }
 0x271   : > { %v513_v12 = vmul.f32 0.25, %v504_v11  ;;  %v519_v15 = vsel %vm515_vm4, %v514_v13, -inf }
 0x272   : > { %v1431_v27 = vpop.f32.mrf.mxu1 }
 0x273   : > { %v516_v14 = vsel %vm515_vm4, %v513_v12, -inf }
 0x274   : > { %517 = vmax.xlane.f32.xlu0 %v516_v14  ;;  %v782_v30 = vpop.f32.mrf.mxu1 }
 0x278   : > { %520 = vmax.xlane.f32.xlu0 %v519_v15 }
 0x2fd   : > { %v518_v19 = vpop.xlane.xlu0 %517 }
 0x2fe   : > { %v522_v20 = vsub.f32 %v513_v12, %v518_v19 }
 0x300   : > { %v524_v21 = vmul.f32 1.442695, %v522_v20 }
 0x301   : > { %v521_v22 = vpop.xlane.xlu0 %520 }
 0x302   : > { %1540 = vpow2.f32 %v524_v21  ;;  %v523_v23 = vsub.f32 %v514_v13, %v521_v22 }
 0x304   : > { %v526_v24 = vmul.f32 1.442695, %v523_v23 }
 0x306   : > { %1542 = vpow2.f32 %v526_v24 }
 0x30f   : > { %v1541_v25 = vpop.eup %1540 }
 0x310   : > { %1417 = vmatprep.mubr.msk.f32.mxu0 %vm515_vm4, %v1541_v25  ;;  %v528_v26 = vsel %vm515_vm4, %v1541_v25, 0.0 }
 0x311   : > { %529 = vadd.xlane.f32.xlu0 %v528_v26 }
 0x313   : > { %v1543_v28 = vpop.eup %1542 }
 0x314   : > { %1418 = vmatmul.mubr.msk.f32.vlgmr.msra.gmra.mxu0 %vm515_vm4, %v1543_v28  ;;  %v531_v45 = vsel %vm515_vm4, %v1543_v28, 0.0 }
 0x315   : > { %1421 = vmatpush3.msra.mxu0 %v624_v18  ;;  %1424 = vmatprep.mubr.msk.f32.mxu0 %vm515_vm4, %v1541_v25 }
 0x316   : > { %1422 = vmatprep.subr.mxu0 %v623_v29 }
 0x317   : > { %1423 = vmatpush3.msra.mxu0 %v623_v29 }
 0x318   : > { %1432 = vmatprep.subr.msk.mxu0 %vm346_vm2, %v1333_v9  ;;  %1425 = vmatmul.mubr.msk.f32.vlgmr.msra.gmra.mxu0 %vm515_vm4, %v1543_v28 }
 0x319   : > { %1433 = vmatpush3.xpose.msk.msra.mxu0 %vm346_vm2, %v1333_v9  ;;  %1436 = vmatprep.mubr.msk.f32.mxu0 %vm346_vm2, %v782_v30 }
 0x31a   : > { %1434 = vmatprep.subr.msk.mxu0 %vm346_vm2, %v1332_v8 }
 0x31d   : > { %1435 = vmatpush3.xpose.msk.msra.mxu0 %vm346_vm2, %v1332_v8 }
 0x320   : > { %1437 = vmatmul.mubr.msk.f32.vlgmr.msra.gmra.mxu0 %vm346_vm2, %v1431_v27 }
 0x39a   : > { %v530_v31 = vpop.xlane.xlu0 %529 }
 0x39b   : > { %1544 = vrcp.f32 %v530_v31 }
 0x3a8   : > { %v1545_v33 = vpop.eup %1544 }
 0x3d4   : > { %v1419_v32 = vpop.f32.mrf.mxu0 }
 0x3d6   : > { %v612_v34 = vpop.f32.mrf.mxu0 }
 0x3d7   : > { %v621_v35 = vmul.f32 %v1545_v33, %v612_v34 }
 0x3d8   : > { %v1426_v36 = vpop.f32.mrf.mxu0 }
 0x3d9   : > { %702 = vst.msk [vmem:[#allocation2] sm:$0xff] %vm346_vm2, %v621_v35 }
 0x3da   : > { %v691_v37 = vpop.f32.mrf.mxu0 }
 0x3db   : > { %v700_v38 = vmul.f32 %v1545_v33, %v691_v37 }
 0x3dd   : > { %705 = vst.msk [vmem:[#allocation3] sm:$0xff] %vm704_vm5, %v700_v38 }
 0x3e0   : > { %v1438_v39 = vpop.f32.mrf.mxu0 }
 0x3e1   : > { %v873_v42 = vmul.f32 0.25, %v1438_v39 }
 0x3e2   : > { %v863_v40 = vpop.f32.mrf.mxu0 }
 0x3e3   : > { %v872_v41 = vmul.f32 0.25, %v863_v40  ;;  %v877_v44 = vsel %vm515_vm4, %v873_v42, -inf }
 0x3e5   : > { %v874_v43 = vsel %vm515_vm4, %v872_v41, -inf }
 0x3e6   : > { %875 = vmax.xlane.f32.xlu1 %v874_v43 }
 0x3ea   : > { %878 = vmax.xlane.f32.xlu1 %v877_v44 }
 0x3ee   : > { %532 = vadd.xlane.f32.xlu1 %v531_v45 }
 0x46f   : > { %v876_v49 = vpop.xlane.xlu1 %875 }
 0x470   : > { %v880_v50 = vsub.f32 %v872_v41, %v876_v49 }
 0x472   : > { %v882_v51 = vmul.f32 1.442695, %v880_v50 }
 0x473   : > { %v879_v52 = vpop.xlane.xlu1 %878 }
 0x474   : > { %1546 = vpow2.f32 %v882_v51  ;;  %v881_v53 = vsub.f32 %v873_v42, %v879_v52 }
 0x476   : > { %v884_v54 = vmul.f32 1.442695, %v881_v53 }
 0x477   : > { %v533_v55 = vpop.xlane.xlu1 %532 }
 0x478   : > { %1548 = vpow2.f32 %v884_v54 }
 0x479   : > { %1550 = vrcp.f32 %v533_v55 }
 0x481   : > { %v1547_v56 = vpop.eup %1546 }
 0x482   : > { %1443 = vmatprep.mubr.msk.f32.mxu1 %vm515_vm4, %v1547_v56  ;;  %v886_v57 = vsel %vm515_vm4, %v1547_v56, 0.0 }
 0x483   : > { %887 = vadd.xlane.f32.xlu0 %v886_v57 }
 0x485   : > { %v1549_v58 = vpop.eup %1548 }
 0x486   : > { %v1551_v60 = vpop.eup %1550  ;;  %1444 = vmatmul.mubr.msk.f32.vlgmr.msra.gmra.mxu1 %vm515_vm4, %v1549_v58  ;;  %v889_v61 = vsel %vm515_vm4, %v1549_v58, 0.0 }
 0x487   : > { %v622_v62 = vmul.f32 %v1551_v60, %v1419_v32  ;;  %v701_v63 = vmul.f32 %v1551_v60, %v1426_v36  ;;  %1447 = vmatpush3.msra.mxu1 %v1346_v48  ;;  %1450 = vmatprep.mubr.msk.f32.mxu1 %vm515_vm4, %v1547_v56 }
 0x488   : > { %1448 = vmatprep.subr.mxu1 %v1345_v59  ;;  %890 = vadd.xlane.f32.xlu1 %v889_v61 }
 0x489   : > { %703 = vst.msk [vmem:[#allocation2 + $0x8] sm:$0xff] %vm346_vm2, %v622_v62  ;;  %1449 = vmatpush3.msra.mxu1 %v1345_v59 }
 0x48a   : > { %706 = vst.msk [vmem:[#allocation3 + $0x8] sm:$0xff] %vm704_vm5, %v701_v63  ;;  %1451 = vmatmul.mubr.msk.f32.vlgmr.msra.gmra.mxu1 %vm515_vm4, %v1549_v58 }
 0x50c   : > { %v888_v1 = vpop.xlane.xlu0 %887 }
 0x511   : > { %v891_v0 = vpop.xlane.xlu1 %890 }
 0x512   : > { %1552 = vrcp.f32 %v891_v0 }
 0x513   : > { %1554 = vrcp.f32 %v888_v1 }
 0x51f   : > { %v1553_v2 = vpop.eup %1552 }
 0x520   : > { %v1555_v5 = vpop.eup %1554 }
 0x546   : > { %v1445_v3 = vpop.f32.mrf.mxu1 }
 0x547   : > { %v981_v4 = vmul.f32 %v1553_v2, %v1445_v3 }
 0x548   : > { %v971_v6 = vpop.f32.mrf.mxu1 }
 0x549   : > { %1063 = vst.msk [vmem:[#allocation2 + $0x18] sm:$0xff] %vm346_vm2, %v981_v4  ;;  %v980_v7 = vmul.f32 %v1555_v5, %v971_v6 }
 0x54a   : > { %v1452_v8 = vpop.f32.mrf.mxu1 }
 0x54b   : > { %1062 = vst.msk [vmem:[#allocation2 + $0x10] sm:$0xff] %vm346_vm2, %v980_v7  ;;  %v1061_v9 = vmul.f32 %v1553_v2, %v1452_v8 }
 0x54c   : > { %v1051_v10 = vpop.f32.mrf.mxu1 }
 0x54d   : > { %1065 = vst.msk [vmem:[#allocation3 + $0x18] sm:$0xff] %vm704_vm5, %v1061_v9  ;;  %v1060_v11 = vmul.f32 %v1555_v5, %v1051_v10 }
 0x54f   : > { %1064 = vst.msk [vmem:[#allocation3 + $0x10] sm:$0xff] %vm704_vm5, %v1060_v11 }
 0x550 PF: > { %v1070_v12 = vld [vmem:[%s1773_s28] sm:$0xf]  ;;  %vm1108_vm6 = vcmask 1043456   ;;  %vm1095_vm7 = vcmask 31744   ;;  %v1067_v15 = vld [vmem:[#allocation2 + $0x8] sm:$0xff]  ;;  %v1069_v16 = vld [vmem:[#allocation2 + $0x18] sm:$0xff] }
 0x551   : > { %v1066_v13 = vld [vmem:[#allocation2] sm:$0xff]  ;;  %1453 = vmatprep.subr.msk.mxu0 %vm1108_vm6, %v1070_v12  ;;  %1461 = vmatprep.subr.msk.mxu1 %vm1108_vm6, %v1070_v12  ;;  %v1654_v19 = vmov 0   ;;  %v1072_v21 = vld [vmem:[#allocation3 + $0x8] sm:$0xff]  ;;  %s1355_s28 = sshll.u32 %s1638_s22, 3  ;;  %s1216_s29 = sshll.u32 %s1775_s24, 4  ;;  %s1867_s29 = int_to_ptr.vmem [resolvable:$true] %s1216_s29 }
 0x552   : > { %v1068_v14 = vld [vmem:[#allocation2 + $0x10] sm:$0xff]  ;;  %1454 = vmatpush3.msk.msra.mxu0 %vm1108_vm6, %v1070_v12  ;;  %1462 = vmatpush3.msk.msra.mxu1 %vm1108_vm6, %v1070_v12  ;;  %v1071_v18 = vld [vmem:[#allocation3] sm:$0xff]  ;;  %s1213_s14 = sadd.s32 %s1634_s21, %s1355_s28  ;;  %s1875_s21 = scalar_lea.sflag [#allocation5], %s250_s12 }
 0x553   : > { %1455 = vmatprep.mubr.msk.f32.mxu0 %vm1095_vm7, %v1066_v13  ;;  %1458 = vmatprep.mubr.msk.f32.mxu1 %vm1095_vm7, %v1068_v14  ;;  %s1356_s15 = sshll.u32 %s1213_s14, 7  ;;  %s1558_s17 = scalar_lea.vmem %s1867_s29, 512 }
 0x554   : > { %1456 = vmatmul.mubr.msk.f32.vlgmr.msra.gmra.mxu0 %vm1095_vm7, %v1067_v15  ;;  %1459 = vmatmul.mubr.msk.f32.vlgmr.msra.gmra.mxu1 %vm1095_vm7, %v1069_v16  ;;  %v1074_v20 = vld [vmem:[#allocation3 + $0x18] sm:$0xff]  ;;  %s1865_s22 = scalar_lea.hbm %s1931_s5, %s1356_s15  ;;  %p1559_p1 = scmp.ne.s32.totalorder %s1867_s29, %s1558_s17 }
 0x555   : > { %1557 = vset.pattern.permute.xlu1 %v1654_v19  ;;  %1556 = vset.pattern.permute.xlu0 %v1654_v19  ;;  %s1655_s26 = smov [#allocation4]  }
 0x556   : > { %v1073_v17 = vld [vmem:[#allocation3 + $0x10] sm:$0xff]  ;;  %1077 = vperm.xlu0 %1556, %v1071_v18   ;;  %p1560_p2 = pnand %p1559_p1, %p1740_p3  ;;  %s1562_s27 = sshll.u32 %s1655_s26, 4  ;;  %s1563_s27 = int_to_ptr.vmem [resolvable:$false] %s1562_s27 }
 0x557   : > { %1087 = vperm.xlu1 %1557, %v1073_v17   ;;  %s1564_s30 = scalar_lea.vmem %s1563_s27, 1024  ;;  %p1565_p5 = scmp.lt.s32.totalorder %s1867_s29, %s1563_s27 }
 0x558   : > { %p1561_p4 = pneg %p1560_p2  ;;  %p1566_p6 = scmp.lt.s32.totalorder %s1564_s30, %s1558_s17 }
 0x55a   : > { %1082 = vperm.xlu0 %1556, %v1072_v21   ;;  %p1567_p7 = por %p1566_p6, %p1565_p5 }
 0x55b   : > { %1092 = vperm.xlu1 %1557, %v1074_v20  }
 0x55c   : > { %p1568_p9 = pnand %p1567_p7, %p1561_p4 }
 0x5d1   : > { %v1078_v23 = vpop.permute.xlu0 %1077 }
 0x5d2   : > { %v1088_v22 = vpop.permute.xlu1 %1087 }
 0x5d5   : > { %v1083_v25 = vpop.permute.xlu0 %1082 }
 0x5d6   : > { %v1093_v24 = vpop.permute.xlu1 %1092 }
 0x614   : > { %v1457_v26 = vpop.f32.mrf.mxu0  ;;  %v1460_v27 = vpop.f32.mrf.mxu1 }
 0x615   : > { %v1184_v28 = vadd.f32 %v1457_v26, %v1083_v25  ;;  %v1194_v29 = vadd.f32 %v1460_v27, %v1093_v24 }
 0x616   : > { %v1178_v30 = vpop.f32.mrf.mxu0  ;;  %v1188_v31 = vpop.f32.mrf.mxu1 }
 0x617   : > { %1198 = vst [vmem:[%s1775_s24 + $0x8] sm:$0xff] %v1184_v28  ;;  %1200 = vst [vmem:[%s1775_s24 + $0x18] sm:$0xff] %v1194_v29  ;;  %v1179_v32 = vadd.f32 %v1178_v30, %v1078_v23  ;;  %v1189_v33 = vadd.f32 %v1188_v31, %v1088_v22 }
 0x619   : > { %1197 = vst [vmem:[%s1775_s24] sm:$0xff] %v1179_v32  ;;  %1199 = vst [vmem:[%s1775_s24 + $0x10] sm:$0xff] %v1189_v33 }
 0x61a   : > { %1571 = shalt.err (!%p1568_p9)
}
 0x61b   : > { %s1572_s24 = scalar_lea.hbm %s1865_s22, 512  ;;  %s1576_s9 = scalar_lea.hbm %s1931_s5, 2048 }
 0x61c   : > { %p1573_p10 = scmp.ne.s32.totalorder %s1865_s22, %s1572_s24  ;;  %p1577_p13 = scmp.lt.s32.totalorder %s1865_s22, %s1931_s5 }
 0x61d   : > { %p1578_p0 = scmp.lt.s32.totalorder %s1576_s9, %s1572_s24 }
 0x61e   : > { %p1574_p11 = pnand %p1573_p10, %p1740_p3 }
 0x61f   : > { %p1579_p1 = por %p1578_p0, %p1577_p13 }
 0x620   : > { %p1575_p12 = pneg %p1574_p11 }
 0x622   : > { %p1580_p2 = pnand %p1579_p1, %p1575_p12 }
 0x624   : > { %1583 = shalt.err (!%p1580_p2)
}
 0x625   : > { %s1656_s14 = smov 128   ;;  %s1657_s15 = smov 256  }
 0x626   : > { %s1658_s13 = smov 8  }
 0x627   : > { %1463 = dma.vmem_to_hbm [thread:$0]  (%p1740_p3), %s1867_s29, 512, %s1865_s22, %s1875_s21, %s1656_s14, %s1657_s15, %s1658_s13  }
 0x628 PF: > { %p1469_p4 = scmp.ge.s32.totalorder %s1650_s25, 2  ;;  %s1231_s16 = sand.u32 1, %s1622_s18  }
 0x629   : > { %s1232_s17 = scalar_lea.sflag [#allocation5], %s1231_s16 }
 0x62a   : > { %p1466_p5 = pnand %p1469_p4, %p1749_p8 }
 0x62c   : > { %p1467_p6 = pneg %p1466_p5 }
 0x62e   : > { %1617 = dma.done.wait (%p1467_p6), %s1232_s17, 512  }
 0x62f   : > { %1619 = vsyncadd (%p1467_p6), %s1232_s17, 4294966784  ;;  %s18_s25 = sadd.s32 1, %s1650_s25   ;;  %s1940_s22 = sld [smem:[#allocation7_spill]] }
 0x630   : > { %p15_p7 = scmp.ge.s32.totalorder %s18_s25, 6   ;;  %s1941_s6 = sld [smem:[#allocation8_spill]] }
 0x631   : > { %s1942_s24 = sld [smem:[#allocation9_spill]]  ;;  %s1943_s18 = smov %s1626_s19 }
 0x632   : > { %s1944_s19 = smov %s1630_s20  ;;  %s1945_s20 = smov %s1758_s11 }
 0x633   : > { %s1946_s21 = smov %s1642_s23  ;;  %17 = sbr.rel (!%p15_p7) target bundleno = 5 (0x5), region = 85 }
 0x636   : > { %s1947_s23 = smov %s1941_s6 }
 0x638   :  { %1237 = vsyncpa [#allocation5], 1 }
 0x639   :  { %1239 = vsyncpa [#allocation5 + $0x1], 1 }

</bundles_post_ra>
